<compile_context>
chip_gen: v6e
topology: v6e:2x2x1
jax: 0.10.0
libtpu: 0.0.40
codegen_flags: <defaults>
</compile_context>

<pallas_src>
import jax
import jax.numpy as jnp
import numpy as np
from jax.experimental import pallas as pl
from jax.experimental.pallas import tpu as pltpu


def _ssn_ce_kernel(mu_ref,      # VMEM (1, C, TILE_P)
                   f_ref,       # VMEM (1, R, C, TILE_P)
                   d_ref,       # VMEM (1, C, TILE_P)
                   epsd_ref,    # VMEM (s_half, 1, C, TILE_P)
                   epsr_ref,    # VMEM (1, s_half, R)
                   tgt_ref,     # VMEM (1, 1, TILE_P) int32
                   out_ref):    # SMEM (B, T) f32  (untiled, per-tile partial sums)
    b = pl.program_id(0)
    t = pl.program_id(1)

    n_classes = mu_ref.shape[1]

    mu = mu_ref[0]                       # (C, TILE_P)
    sqrt_d = jnp.sqrt(d_ref[0])          # (C, TILE_P)
    tgt = tgt_ref[0]                     # (1, TILE_P) int32
    eps_r = epsr_ref[0]                  # (s_half, R)

    # fixed_re_parametrization_trick: evaluate mu + n_k and mu - n_k for every
    # drawn noise n_k -> stack the +/- pair once along the sample axis.
    eps_pm = jnp.concatenate([eps_r, -eps_r], axis=0)          # (2*s_half, R)

    # Per-class logits for all (antithetic) samples; rank contraction on MXU.
    logits = []
    for c in range(n_classes):
        f_c = f_ref[0, :, c, :]                                 # (R, TILE_P)
        low = jnp.dot(eps_pm, f_c,
                      preferred_element_type=jnp.float32)       # (2*s_half, TILE_P)
        diag = sqrt_d[c:c + 1, :] * epsd_ref[:, 0, c, :]        # (s_half, TILE_P)
        diag_pm = jnp.concatenate([diag, -diag], axis=0)        # (2*s_half, TILE_P)
        logits.append(mu[c:c + 1, :] + low + diag_pm)

    # Pixel-wise softmax cross-entropy; target logit via integer compare/select
    # (no one-hot input needed).
    m = logits[0]
    for c in range(1, n_classes):
        m = jnp.maximum(m, logits[c])
    sum_exp = jnp.zeros_like(m)
    tgt_logit = jnp.zeros_like(m)
    for c in range(n_classes):
        sum_exp = sum_exp + jnp.exp(logits[c] - m)
        tgt_logit = tgt_logit + jnp.where(tgt == c, logits[c], 0.0)
    ce = (m + jnp.log(sum_exp)) - tgt_logit                     # (2*s_half, TILE_P)

    out_ref[b, t] = jnp.sum(ce)


def _pick_tile_p(P, C, R, s_half, budget_bytes=8 * 1024 * 1024):
    """Largest multiple-of-128 divisor of P whose per-tile VMEM footprint
    (double-buffered inputs + live intermediates, sublane padding included)
    fits `budget_bytes`.  Conservative enough for v5e / v6e / v7x."""
    if P % 128 != 0:
        return P                       # full-extent block is always legal
    c_pad = ((C + 7) // 8) * 8
    s_pad = ((2 * s_half + 7) // 8) * 8
    # f32 bytes per lane column: (mu + d + R*f + s_half*eps_d + target) x 2
    # buffers, plus ~8 live (2*s_half, TILE_P) intermediates.
    per_lane = 4 * 2 * (c_pad * (2 + R + s_half) + 8) + 4 * s_pad * 8
    cap = max(128, (budget_bytes // per_lane) // 128 * 128)
    tile = 128
    for cand in range(128, min(P, cap) + 1, 128):
        if P % cand == 0:
            tile = cand
    return tile


def ssn_sample_ce_loss(mean, cov_factor, cov_diag, target, eps_r, eps_d, num_samples):
    """mean: (B,C,H,W), cov_factor: (B,C*H*W,R), cov_diag: (B,C*H*W),
       target: (B,H,W) int, eps_r: (S/2,B,R), eps_d: (S/2,B,C*H*W)."""
    B, C, H, W = mean.shape
    P = H * W
    N = C * P
    R = cov_factor.shape[-1]
    assert num_samples % 2 == 0
    s_half = num_samples // 2
    assert eps_r.shape == (s_half, B, R)
    assert eps_d.shape == (s_half, B, N)

    tile_p = _pick_tile_p(P, C, R, s_half)
    assert P % tile_p == 0
    n_tiles = P // tile_p

    # --- glue: cheap (free-reshape) relayouts only, except cov_factor -------
    mu = mean.reshape(B, C, P).astype(jnp.float32)
    d = cov_diag.reshape(B, C, P).astype(jnp.float32)
    # One-time relayout of the low-rank factor to (B, R, C, P).
    # TODO(synk): push this relayout upstream to where cov_factor is produced.
    f = cov_factor.reshape(B, C, P, R).transpose(0, 3, 1, 2).astype(jnp.float32)
    epsd = eps_d.reshape(s_half, B, C, P).astype(jnp.float32)   # no transpose
    epsr = eps_r.transpose(1, 0, 2).astype(jnp.float32)         # (B, s_half, R), tiny
    tgt = target.reshape(B, 1, P).astype(jnp.int32)

    partials = pl.pallas_call(
        _ssn_ce_kernel,
        out_shape=jax.ShapeDtypeStruct((B, n_tiles), jnp.float32),
        grid=(B, n_tiles),
        in_specs=[
            pl.BlockSpec((1, C, tile_p), lambda b, t: (b, 0, t)),            # mean
            pl.BlockSpec((1, R, C, tile_p), lambda b, t: (b, 0, 0, t)),      # cov_factor
            pl.BlockSpec((1, C, tile_p), lambda b, t: (b, 0, t)),            # cov_diag
            pl.BlockSpec((s_half, 1, C, tile_p), lambda b, t: (0, b, 0, t)), # eps_d
            pl.BlockSpec((1, s_half, R), lambda b, t: (b, 0, 0)),            # eps_r
            pl.BlockSpec((1, 1, tile_p), lambda b, t: (b, 0, t)),            # target
        ],
        out_specs=pl.BlockSpec(memory_space=pltpu.MemorySpace.SMEM),
        compiler_params=pltpu.CompilerParams(
            # NOTE: grid points are fully independent; kept "arbitrary" for
            # portability with the untiled SMEM output (megacore sharding on
            # v7x would need a tiled per-core output).
            dimension_semantics=("arbitrary", "arbitrary"),
            vmem_limit_bytes=32 * 1024 * 1024,
        ),
    )(mu, f, d, epsd, epsr, tgt)

    return jnp.sum(partials) / float(num_samples * B * P)


def ref_loss(mean, cov_factor, cov_diag, target, eps_r, eps_d, num_samples):
    """Pure-JAX reference mirroring the PyTorch module semantics."""
    B, C, H, W = mean.shape
    N = C * H * W
    mu = mean.reshape(B, N)
    noise = jnp.einsum('sbr,bnr->sbn', eps_r, cov_factor) + jnp.sqrt(cov_diag)[None] * eps_d
    # fixed_re_parametrization_trick: cat([samples - mean, -(samples - mean)]) + mean
    samples = jnp.concatenate([mu[None] + noise, mu[None] - noise], axis=0)     # (S, B, N)
    logits = samples.reshape(num_samples, B, C, H, W)
    logp = jax.nn.log_softmax(logits, axis=2)
    idx = jnp.broadcast_to(target[None, :, None, :, :].astype(jnp.int32),
                           (num_samples, B, 1, H, W))
    tgt_lp = jnp.take_along_axis(logp, idx, axis=2)[:, :, 0]                    # (S, B, H, W)
    ce_per_sample = -jnp.mean(tgt_lp, axis=(1, 2, 3))
    return jnp.sum(ce_per_sample) / num_samples


if __name__ == "__main__":
    B, C, H, W, R, S = 2, 4, 16, 16, 8, 10
    N = C * H * W
    s_half = S // 2

    key = jax.random.PRNGKey(0)
    k1, k2, k3, k4, k5, k6 = jax.random.split(key, 6)
    mean = jax.random.normal(k1, (B, C, H, W), jnp.float32)
    cov_factor = 0.1 * jax.random.normal(k2, (B, N, R), jnp.float32)
    cov_diag = 0.05 + jax.random.uniform(k3, (B, N), jnp.float32, 0.0, 0.3)
    target = jax.random.randint(k4, (B, H, W), 0, C)
    # explicit standard-normal noise for dist.rsample((S//2,)) (torch RNG not reproducible)
    eps_r = jax.random.normal(k5, (s_half, B, R), jnp.float32)
    eps_d = jax.random.normal(k6, (s_half, B, N), jnp.float32)

    loss = ssn_sample_ce_loss(mean, cov_factor, cov_diag, target, eps_r, eps_d, S)
    loss = jax.block_until_ready(loss)

    ref = ref_loss(mean, cov_factor, cov_diag, target, eps_r, eps_d, S)
    np.testing.assert_allclose(np.asarray(loss), np.asarray(ref), rtol=1e-3, atol=1e-4)
    print("KERNEL_OK")
</pallas_src>

<mosaic_0001>
module attributes {stable_mosaic.version = 11 : i64} {
  func.func @_ssn_ce_kernel(%arg0: i32, %arg1: i32, %arg2: memref<1x4x256xf32, #tpu.memory_space<vmem>>, %arg3: memref<1x8x4x256xf32, #tpu.memory_space<vmem>>, %arg4: memref<1x4x256xf32, #tpu.memory_space<vmem>>, %arg5: memref<5x1x4x256xf32, #tpu.memory_space<vmem>>, %arg6: memref<1x5x8xf32, #tpu.memory_space<vmem>>, %arg7: memref<1x1x256xi32, #tpu.memory_space<vmem>>, %arg8: memref<2x1xf32, #tpu.memory_space<smem>>) attributes {dimension_semantics = [#tpu.dimension_semantics<arbitrary>, #tpu.dimension_semantics<arbitrary>], iteration_bounds = array<i64: 2, 1>, scalar_prefetch = 0 : i64, scratch_operands = 0 : i64, tpu.core_type = #tpu.core_type<tc>, window_params = [{transform_indices = @transform_0, window_bounds = array<i64: 1, 4, 256>}, {transform_indices = @transform_1, window_bounds = array<i64: 1, 8, 4, 256>}, {transform_indices = @transform_2, window_bounds = array<i64: 1, 4, 256>}, {transform_indices = @transform_3, window_bounds = array<i64: 5, 1, 4, 256>}, {transform_indices = @transform_4, window_bounds = array<i64: 1, 5, 8>}, {transform_indices = @transform_5, window_bounds = array<i64: 1, 1, 256>}, {transform_indices = @transform_6, window_bounds = array<i64: 2, 1>}]} {
    %c0 = arith.constant 0 : index
    %c0_0 = arith.constant 0 : index
    %c0_1 = arith.constant 0 : index
    %0 = vector.load %arg2[%c0, %c0_0, %c0_1] : memref<1x4x256xf32, #tpu.memory_space<vmem>>, vector<1x4x256xf32>
    %1 = vector.shape_cast %0 : vector<1x4x256xf32> to vector<4x256xf32>
    %c0_2 = arith.constant 0 : index
    %c0_3 = arith.constant 0 : index
    %c0_4 = arith.constant 0 : index
    %2 = vector.load %arg4[%c0_2, %c0_3, %c0_4] : memref<1x4x256xf32, #tpu.memory_space<vmem>>, vector<1x4x256xf32>
    %3 = vector.shape_cast %2 : vector<1x4x256xf32> to vector<4x256xf32>
    %4 = math.sqrt %3 : vector<4x256xf32>
    %c0_5 = arith.constant 0 : index
    %c0_6 = arith.constant 0 : index
    %c0_7 = arith.constant 0 : index
    %5 = vector.load %arg7[%c0_5, %c0_6, %c0_7] : memref<1x1x256xi32, #tpu.memory_space<vmem>>, vector<1x1x256xi32>
    %6 = vector.shape_cast %5 : vector<1x1x256xi32> to vector<1x256xi32>
    %c0_8 = arith.constant 0 : index
    %c0_9 = arith.constant 0 : index
    %c0_10 = arith.constant 0 : index
    %7 = vector.load %arg6[%c0_8, %c0_9, %c0_10] : memref<1x5x8xf32, #tpu.memory_space<vmem>>, vector<1x5x8xf32>
    %8 = vector.shape_cast %7 : vector<1x5x8xf32> to vector<5x8xf32>
    %cst = arith.constant 0.000000e+00 : f32
    %9 = vector.broadcast %cst : f32 to vector<5x8xf32>
    %10 = arith.subf %9, %8 : vector<5x8xf32>
    %11 = tpu.concatenate %8, %10 in 0 : vector<5x8xf32>, vector<5x8xf32> -> vector<10x8xf32>
    %c0_11 = arith.constant 0 : index
    %c0_12 = arith.constant 0 : index
    %c0_13 = arith.constant 0 : index
    %c0_14 = arith.constant 0 : index
    %12 = vector.load %arg3[%c0_11, %c0_12, %c0_13, %c0_14] : memref<1x8x4x256xf32, #tpu.memory_space<vmem>>, vector<1x8x1x256xf32>
    %13 = vector.shape_cast %12 : vector<1x8x1x256xf32> to vector<8x256xf32>
    %cst_15 = arith.constant dense<0.000000e+00> : vector<10x256xf32>
    %14 = tpu.matmul %11, %13, %cst_15 {dimension_numbers = #tpu.dot_dimension_numbers<[1], [0], [0], [1], [0, 0, 1, 1], [], []>} : vector<10x8xf32>, vector<8x256xf32>, vector<10x256xf32> -> vector<10x256xf32>
    %15 = vector.extract_strided_slice %4 {offsets = [0, 0], sizes = [1, 256], strides = [1, 1]} : vector<4x256xf32> to vector<1x256xf32>
    %c0_16 = arith.constant 0 : index
    %c0_17 = arith.constant 0 : index
    %c0_18 = arith.constant 0 : index
    %c0_19 = arith.constant 0 : index
    %16 = vector.load %arg5[%c0_16, %c0_17, %c0_18, %c0_19] : memref<5x1x4x256xf32, #tpu.memory_space<vmem>>, vector<5x1x1x256xf32>
    %17 = vector.shape_cast %16 : vector<5x1x1x256xf32> to vector<5x256xf32>
    %18 = vector.broadcast %15 : vector<1x256xf32> to vector<5x256xf32>
    %19 = arith.mulf %18, %17 : vector<5x256xf32>
    %cst_20 = arith.constant 0.000000e+00 : f32
    %20 = vector.broadcast %cst_20 : f32 to vector<5x256xf32>
    %21 = arith.subf %20, %19 : vector<5x256xf32>
    %22 = tpu.concatenate %19, %21 in 0 : vector<5x256xf32>, vector<5x256xf32> -> vector<10x256xf32>
    %23 = vector.extract_strided_slice %1 {offsets = [0, 0], sizes = [1, 256], strides = [1, 1]} : vector<4x256xf32> to vector<1x256xf32>
    %24 = vector.broadcast %23 : vector<1x256xf32> to vector<10x256xf32>
    %25 = arith.addf %24, %14 : vector<10x256xf32>
    %26 = arith.addf %25, %22 : vector<10x256xf32>
    %c0_21 = arith.constant 0 : index
    %c0_22 = arith.constant 0 : index
    %c1 = arith.constant 1 : index
    %c0_23 = arith.constant 0 : index
    %27 = vector.load %arg3[%c0_21, %c0_22, %c1, %c0_23] : memref<1x8x4x256xf32, #tpu.memory_space<vmem>>, vector<1x8x1x256xf32>
    %28 = vector.shape_cast %27 : vector<1x8x1x256xf32> to vector<8x256xf32>
    %cst_24 = arith.constant dense<0.000000e+00> : vector<10x256xf32>
    %29 = tpu.matmul %11, %28, %cst_24 {dimension_numbers = #tpu.dot_dimension_numbers<[1], [0], [0], [1], [0, 0, 1, 1], [], []>} : vector<10x8xf32>, vector<8x256xf32>, vector<10x256xf32> -> vector<10x256xf32>
    %30 = vector.extract_strided_slice %4 {offsets = [1, 0], sizes = [1, 256], strides = [1, 1]} : vector<4x256xf32> to vector<1x256xf32>
    %c0_25 = arith.constant 0 : index
    %c0_26 = arith.constant 0 : index
    %c1_27 = arith.constant 1 : index
    %c0_28 = arith.constant 0 : index
    %31 = vector.load %arg5[%c0_25, %c0_26, %c1_27, %c0_28] : memref<5x1x4x256xf32, #tpu.memory_space<vmem>>, vector<5x1x1x256xf32>
    %32 = vector.shape_cast %31 : vector<5x1x1x256xf32> to vector<5x256xf32>
    %33 = vector.broadcast %30 : vector<1x256xf32> to vector<5x256xf32>
    %34 = arith.mulf %33, %32 : vector<5x256xf32>
    %cst_29 = arith.constant 0.000000e+00 : f32
    %35 = vector.broadcast %cst_29 : f32 to vector<5x256xf32>
    %36 = arith.subf %35, %34 : vector<5x256xf32>
    %37 = tpu.concatenate %34, %36 in 0 : vector<5x256xf32>, vector<5x256xf32> -> vector<10x256xf32>
    %38 = vector.extract_strided_slice %1 {offsets = [1, 0], sizes = [1, 256], strides = [1, 1]} : vector<4x256xf32> to vector<1x256xf32>
    %39 = vector.broadcast %38 : vector<1x256xf32> to vector<10x256xf32>
    %40 = arith.addf %39, %29 : vector<10x256xf32>
    %41 = arith.addf %40, %37 : vector<10x256xf32>
    %c0_30 = arith.constant 0 : index
    %c0_31 = arith.constant 0 : index
    %c2 = arith.constant 2 : index
    %c0_32 = arith.constant 0 : index
    %42 = vector.load %arg3[%c0_30, %c0_31, %c2, %c0_32] : memref<1x8x4x256xf32, #tpu.memory_space<vmem>>, vector<1x8x1x256xf32>
    %43 = vector.shape_cast %42 : vector<1x8x1x256xf32> to vector<8x256xf32>
    %cst_33 = arith.constant dense<0.000000e+00> : vector<10x256xf32>
    %44 = tpu.matmul %11, %43, %cst_33 {dimension_numbers = #tpu.dot_dimension_numbers<[1], [0], [0], [1], [0, 0, 1, 1], [], []>} : vector<10x8xf32>, vector<8x256xf32>, vector<10x256xf32> -> vector<10x256xf32>
    %45 = vector.extract_strided_slice %4 {offsets = [2, 0], sizes = [1, 256], strides = [1, 1]} : vector<4x256xf32> to vector<1x256xf32>
    %c0_34 = arith.constant 0 : index
    %c0_35 = arith.constant 0 : index
    %c2_36 = arith.constant 2 : index
    %c0_37 = arith.constant 0 : index
    %46 = vector.load %arg5[%c0_34, %c0_35, %c2_36, %c0_37] : memref<5x1x4x256xf32, #tpu.memory_space<vmem>>, vector<5x1x1x256xf32>
    %47 = vector.shape_cast %46 : vector<5x1x1x256xf32> to vector<5x256xf32>
    %48 = vector.broadcast %45 : vector<1x256xf32> to vector<5x256xf32>
    %49 = arith.mulf %48, %47 : vector<5x256xf32>
    %cst_38 = arith.constant 0.000000e+00 : f32
    %50 = vector.broadcast %cst_38 : f32 to vector<5x256xf32>
    %51 = arith.subf %50, %49 : vector<5x256xf32>
    %52 = tpu.concatenate %49, %51 in 0 : vector<5x256xf32>, vector<5x256xf32> -> vector<10x256xf32>
    %53 = vector.extract_strided_slice %1 {offsets = [2, 0], sizes = [1, 256], strides = [1, 1]} : vector<4x256xf32> to vector<1x256xf32>
    %54 = vector.broadcast %53 : vector<1x256xf32> to vector<10x256xf32>
    %55 = arith.addf %54, %44 : vector<10x256xf32>
    %56 = arith.addf %55, %52 : vector<10x256xf32>
    %c0_39 = arith.constant 0 : index
    %c0_40 = arith.constant 0 : index
    %c3 = arith.constant 3 : index
    %c0_41 = arith.constant 0 : index
    %57 = vector.load %arg3[%c0_39, %c0_40, %c3, %c0_41] : memref<1x8x4x256xf32, #tpu.memory_space<vmem>>, vector<1x8x1x256xf32>
    %58 = vector.shape_cast %57 : vector<1x8x1x256xf32> to vector<8x256xf32>
    %cst_42 = arith.constant dense<0.000000e+00> : vector<10x256xf32>
    %59 = tpu.matmul %11, %58, %cst_42 {dimension_numbers = #tpu.dot_dimension_numbers<[1], [0], [0], [1], [0, 0, 1, 1], [], []>} : vector<10x8xf32>, vector<8x256xf32>, vector<10x256xf32> -> vector<10x256xf32>
    %60 = vector.extract_strided_slice %4 {offsets = [3, 0], sizes = [1, 256], strides = [1, 1]} : vector<4x256xf32> to vector<1x256xf32>
    %c0_43 = arith.constant 0 : index
    %c0_44 = arith.constant 0 : index
    %c3_45 = arith.constant 3 : index
    %c0_46 = arith.constant 0 : index
    %61 = vector.load %arg5[%c0_43, %c0_44, %c3_45, %c0_46] : memref<5x1x4x256xf32, #tpu.memory_space<vmem>>, vector<5x1x1x256xf32>
    %62 = vector.shape_cast %61 : vector<5x1x1x256xf32> to vector<5x256xf32>
    %63 = vector.broadcast %60 : vector<1x256xf32> to vector<5x256xf32>
    %64 = arith.mulf %63, %62 : vector<5x256xf32>
    %cst_47 = arith.constant 0.000000e+00 : f32
    %65 = vector.broadcast %cst_47 : f32 to vector<5x256xf32>
    %66 = arith.subf %65, %64 : vector<5x256xf32>
    %67 = tpu.concatenate %64, %66 in 0 : vector<5x256xf32>, vector<5x256xf32> -> vector<10x256xf32>
    %68 = vector.extract_strided_slice %1 {offsets = [3, 0], sizes = [1, 256], strides = [1, 1]} : vector<4x256xf32> to vector<1x256xf32>
    %69 = vector.broadcast %68 : vector<1x256xf32> to vector<10x256xf32>
    %70 = arith.addf %69, %59 : vector<10x256xf32>
    %71 = arith.addf %70, %67 : vector<10x256xf32>
    %72 = arith.maximumf %26, %41 : vector<10x256xf32>
    %73 = arith.maximumf %72, %56 : vector<10x256xf32>
    %74 = arith.maximumf %73, %71 : vector<10x256xf32>
    %cst_48 = arith.constant 0.000000e+00 : f32
    %75 = vector.broadcast %cst_48 : f32 to vector<10x256xf32>
    %cst_49 = arith.constant 0.000000e+00 : f32
    %76 = vector.broadcast %cst_49 : f32 to vector<10x256xf32>
    %77 = arith.subf %26, %74 : vector<10x256xf32>
    %78 = math.exp %77 : vector<10x256xf32>
    %79 = arith.addf %75, %78 : vector<10x256xf32>
    %c0_i32 = arith.constant 0 : i32
    %80 = vector.broadcast %c0_i32 : i32 to vector<1x256xi32>
    %81 = arith.cmpi eq, %6, %80 : vector<1x256xi32>
    %cst_50 = arith.constant 0.000000e+00 : f32
    %82 = vector.shape_cast %81 : vector<1x256xi1> to vector<1x256xi1>
    %83 = vector.broadcast %82 : vector<1x256xi1> to vector<10x256xi1>
    %84 = vector.broadcast %cst_50 : f32 to vector<10x256xf32>
    %85 = arith.select %83, %26, %84 : vector<10x256xi1>, vector<10x256xf32>
    %86 = arith.addf %76, %85 : vector<10x256xf32>
    %87 = arith.subf %41, %74 : vector<10x256xf32>
    %88 = math.exp %87 : vector<10x256xf32>
    %89 = arith.addf %79, %88 : vector<10x256xf32>
    %c1_i32 = arith.constant 1 : i32
    %90 = vector.broadcast %c1_i32 : i32 to vector<1x256xi32>
    %91 = arith.cmpi eq, %6, %90 : vector<1x256xi32>
    %cst_51 = arith.constant 0.000000e+00 : f32
    %92 = vector.shape_cast %91 : vector<1x256xi1> to vector<1x256xi1>
    %93 = vector.broadcast %92 : vector<1x256xi1> to vector<10x256xi1>
    %94 = vector.broadcast %cst_51 : f32 to vector<10x256xf32>
    %95 = arith.select %93, %41, %94 : vector<10x256xi1>, vector<10x256xf32>
    %96 = arith.addf %86, %95 : vector<10x256xf32>
    %97 = arith.subf %56, %74 : vector<10x256xf32>
    %98 = math.exp %97 : vector<10x256xf32>
    %99 = arith.addf %89, %98 : vector<10x256xf32>
    %c2_i32 = arith.constant 2 : i32
    %100 = vector.broadcast %c2_i32 : i32 to vector<1x256xi32>
    %101 = arith.cmpi eq, %6, %100 : vector<1x256xi32>
    %cst_52 = arith.constant 0.000000e+00 : f32
    %102 = vector.shape_cast %101 : vector<1x256xi1> to vector<1x256xi1>
    %103 = vector.broadcast %102 : vector<1x256xi1> to vector<10x256xi1>
    %104 = vector.broadcast %cst_52 : f32 to vector<10x256xf32>
    %105 = arith.select %103, %56, %104 : vector<10x256xi1>, vector<10x256xf32>
    %106 = arith.addf %96, %105 : vector<10x256xf32>
    %107 = arith.subf %71, %74 : vector<10x256xf32>
    %108 = math.exp %107 : vector<10x256xf32>
    %109 = arith.addf %99, %108 : vector<10x256xf32>
    %c3_i32 = arith.constant 3 : i32
    %110 = vector.broadcast %c3_i32 : i32 to vector<1x256xi32>
    %111 = arith.cmpi eq, %6, %110 : vector<1x256xi32>
    %cst_53 = arith.constant 0.000000e+00 : f32
    %112 = vector.shape_cast %111 : vector<1x256xi1> to vector<1x256xi1>
    %113 = vector.broadcast %112 : vector<1x256xi1> to vector<10x256xi1>
    %114 = vector.broadcast %cst_53 : f32 to vector<10x256xf32>
    %115 = arith.select %113, %71, %114 : vector<10x256xi1>, vector<10x256xf32>
    %116 = arith.addf %106, %115 : vector<10x256xf32>
    %117 = math.log %109 : vector<10x256xf32>
    %118 = arith.addf %74, %117 : vector<10x256xf32>
    %119 = arith.subf %118, %116 : vector<10x256xf32>
    %120 = vector.shape_cast %119 : vector<10x256xf32> to vector<1x10x256xf32>
    %cst_54 = arith.constant dense<0.000000e+00> : vector<1xf32>
    %121 = vector.multi_reduction <add>, %120, %cst_54 [1, 2] : vector<1x10x256xf32> to vector<1xf32>
    %122 = vector.shape_cast %121 : vector<1xf32> to vector<1x1x1xf32>
    %123 = vector.extract %122[0, 0, 0] : f32 from vector<1x1x1xf32>
    %124 = arith.index_cast %arg0 : i32 to index
    %125 = arith.index_cast %arg1 : i32 to index
    %126 = memref.load %arg8[%124, %125] : memref<2x1xf32, #tpu.memory_space<smem>>
    memref.store %123, %arg8[%124, %125] : memref<2x1xf32, #tpu.memory_space<smem>>
    return
  }
  func.func @transform_0(%arg0: i32, %arg1: i32) -> (i32, i32, i32) {
    %c0_i32 = arith.constant 0 : i32
    %c0_i32_0 = arith.constant 0 : i32
    return %arg0, %c0_i32, %arg1 : i32, i32, i32
  }
  func.func @transform_1(%arg0: i32, %arg1: i32) -> (i32, i32, i32, i32) {
    %c0_i32 = arith.constant 0 : i32
    %c0_i32_0 = arith.constant 0 : i32
    %c0_i32_1 = arith.constant 0 : i32
    return %arg0, %c0_i32, %c0_i32_0, %arg1 : i32, i32, i32, i32
  }
  func.func @transform_2(%arg0: i32, %arg1: i32) -> (i32, i32, i32) {
    %c0_i32 = arith.constant 0 : i32
    %c0_i32_0 = arith.constant 0 : i32
    return %arg0, %c0_i32, %arg1 : i32, i32, i32
  }
  func.func @transform_3(%arg0: i32, %arg1: i32) -> (i32, i32, i32, i32) {
    %c0_i32 = arith.constant 0 : i32
    %c0_i32_0 = arith.constant 0 : i32
    %c0_i32_1 = arith.constant 0 : i32
    return %c0_i32, %arg0, %c0_i32_0, %arg1 : i32, i32, i32, i32
  }
  func.func @transform_4(%arg0: i32, %arg1: i32) -> (i32, i32, i32) {
    %c0_i32 = arith.constant 0 : i32
    %c0_i32_0 = arith.constant 0 : i32
    %c0_i32_1 = arith.constant 0 : i32
    return %arg0, %c0_i32, %c0_i32_0 : i32, i32, i32
  }
  func.func @transform_5(%arg0: i32, %arg1: i32) -> (i32, i32, i32) {
    %c0_i32 = arith.constant 0 : i32
    %c0_i32_0 = arith.constant 0 : i32
    return %arg0, %c0_i32, %arg1 : i32, i32, i32
  }
  func.func @transform_6(%arg0: i32, %arg1: i32) -> (i32, i32) {
    %c0_i32 = arith.constant 0 : i32
    %c0_i32_0 = arith.constant 0 : i32
    %c0_i32_1 = arith.constant 0 : i32
    return %c0_i32, %c0_i32_0 : i32, i32
  }
}

</mosaic_0001>

<bundles_post_ra>
// kernel: tpu_custom_call.1
= control target key start
LH: loop header
LB: loop body
LE: loop exit
PB: predicated region body
PF: predicated region fallthrough
CT: control target
= control target key end

     0   :  { %s3075_s0 = inlined_call_operand.vmem [shape: f32[2,4,256], index: 0, kind: input, shape index: {}]   ;;  %s3076_s1 = inlined_call_operand.hbm [shape: f32[2,8,4,256], index: 1, kind: input, shape index: {}]   ;;  %s3077_s2 = inlined_call_operand.hbm [shape: f32[2,4,256], index: 2, kind: input, shape index: {}]   ;;  %s3078_s3 = inlined_call_operand.hbm [shape: f32[5,2,4,256], index: 3, kind: input, shape index: {}]   ;;  %s3079_s4 = inlined_call_operand.vmem [shape: f32[2,5,8], index: 4, kind: input, shape index: {}]   ;;  %s3080_s5 = inlined_call_operand.vmem [shape: s32[2,1,256], index: 5, kind: input, shape index: {}]   ;;  %s3081_s6 = inlined_call_operand.vmem [shape: f32[2,1], index: 6, kind: output, shape index: {}]  }
   0x1   :  { %3083 = sst [smem:[#allocation13_spill]] %s3077_s2 }
   0x2   :  { %3084 = sst [smem:[#allocation14_spill]] %s3078_s3 }
   0x3   :  { %11 = vsyncpa [#allocation3], 0 }
   0x4   :  { %13 = vsyncpa [#allocation3 + $0x1], 0 }
   0x5   :  { %14 = vsyncpa [#allocation6], 0 }
   0x6   :  { %16 = vsyncpa [#allocation6 + $0x1], 0 }
   0x7   :  { %17 = vsyncpa [#allocation4], 0  ;;  %s2437_s21 = smov 0   ;;  %s2439_s22 = smov 0  }
   0x8   :  { %s2441_s23 = smov 0   ;;  %s2443_s24 = smov 0  }
   0x9   :  { %s2445_s25 = smov 0   ;;  %s2447_s26 = smov 0  }
   0xa LB: > { %s2466_s27 = sadd.s32 4294967295, %s2390_s26   ;;  %s35_s28 = sadd.s32 1, %s2386_s25  ;;  %s2390_s26 = sphi %s2447_s26, %s23_s26   ;;  %s2386_s25 = sphi %s2445_s25, %s3112_s25   ;;  %s2382_s24 = sphi %s2443_s24, %s3111_s24   ;;  %s2378_s23 = sphi %s2441_s23, %s3110_s23   ;;  %s2374_s22 = sphi %s2439_s22, %s3109_s22   ;;  %s2370_s21 = sphi %s2437_s21, %s3108_s21  }
   0xb   : > { %p37_p0 = scmp.ge.s32.totalorder %s35_s28, 2  ;;  %s72_s29 = sadd.s32 1, %s2378_s23 }
   0xc   : > { %p79_p1 = scmp.ne.s32.totalorder %s2378_s23, %s2374_s22  ;;  %p80_p2 = scmp.eq.s32.totalorder %s2390_s26, 0 }
   0xd   : > { %s3114_s28 = smov (%p37_p0, %s35_s28), 0  ;;  %p85_p4 = scmp.ne.s32.totalorder %s2374_s22, %s2370_s21 }
   0xe   : > { %3085 = sst [smem:[#allocation12_spill]] %s3114_s28  ;;  %p81_p3 = por %p80_p2, %p79_p1 }
   0xf   : > { %s67_s30 = ssub.s32 %s2386_s25, %s3114_s28  ;;  %p86_p5 = scmp.eq.s32.totalorder %s2466_s27, 0 }
  0x10   : > { %p70_p6 = scmp.eq.s32.totalorder %s67_s30, 0  ;;  %p2134_p8 = scmp.lt.s32.totalorder %s2390_s26, 2 }
  0x11   : > { %p2479_p7 = por %p86_p5, %p85_p4  ;;  %s2488_s9 = sand.u32 1, %s2378_s23  }
  0x12   : > { %s2485_s8 = scalar_select %p70_p6, %s2378_s23, %s72_s29  }
  0x13   : > { %p2490_p9 = pnand %p2134_p8, %p81_p3  ;;  %s276_s11 = sand.u32 1, %s2390_s26  }
  0x14   : > { %s2031_s12 = sshll.u32 %s2488_s9, 3  ;;  %s2107_s13 = sshll.u32 %s2386_s25, 7 }
  0x15   : > { %s3088_s2 = sld [smem:[#allocation13_spill]]  ;;  %s280_s17 = scalar_lea.vmem [#allocation5], %s2031_s12 }
  0x16   : > { %s290_s18 = sshll.u32 %s280_s17, 4  ;;  %s2110_s19 = smul.u32 40, %s2488_s9  ;;  %s291_s18 = int_to_ptr.vmem [resolvable:$true] %s290_s18 }
  0x17   : > { %s2501_s20 = scalar_lea.sflag [#allocation6], %s276_s11  ;;  %p2236_p10 = pneg %p2490_p9 }
  0x18   : > { %s2247_s21 = scalar_lea.vmem %s291_s18, 128  ;;  %s2392_s29 = smov [#allocation5]  }
  0x19   : > { %p2248_p11 = scmp.ne.s32.totalorder %s291_s18, %s2247_s21  ;;  %s2252_s30 = sshll.u32 %s2392_s29, 4  ;;  %s2253_s30 = int_to_ptr.vmem [resolvable:$false] %s2252_s30 }
  0x1a   : > { %s2254_s28 = scalar_lea.vmem %s2253_s30, 256  ;;  %p2255_p0 = scmp.lt.s32.totalorder %s291_s18, %s2253_s30 }
  0x1b   : > { %s288_s16 = scalar_lea.hbm %s3088_s2, %s2107_s13  ;;  %p2250_p12 = pnand %p2248_p11, %p2236_p10 }
  0x1c   : > { %p2256_p1 = scmp.lt.s32.totalorder %s2254_s28, %s2247_s21 }
  0x1d   : > { %p2251_p13 = pneg %p2250_p12 }
  0x1e   : > { %p2257_p2 = por %p2256_p1, %p2255_p0 }
  0x20   : > { %p2258_p3 = pnand %p2257_p2, %p2251_p13 }
  0x22   : > { %2261 = shalt.err (!%p2258_p3)
}
  0x23   : > { %2130 = dma.hbm_to_vmem [thread:$0]  (!%p2490_p9), %s288_s16, 128, %s291_s18, %s2501_s20  }
  0x24   : > { %s3089_s3 = sld [smem:[#allocation14_spill]]  ;;  %s301_s15 = scalar_lea.vmem [#allocation7], %s2110_s19 }
  0x25   : > { %s310_s28 = sshll.u32 %s301_s15, 4  ;;  %p2036_p4 = scmp.ge.s32.totalorder %s2390_s26, 1  ;;  %s2517_s28 = int_to_ptr.vmem [resolvable:$true] %s310_s28 }
  0x26   : > { %p337_p5 = scmp.lt.s32.totalorder %s2390_s26, 3  ;;  %s2028_s21 = sshll.u32 %s2488_s9, 6 }
  0x27   : > { %s2106_s29 = sshll.u32 %s2386_s25, 10  ;;  %s257_s11 = scalar_lea.vmem [#allocation2], %s2028_s21 }
  0x28   : > { %p2520_p6 = pnand %p2036_p4, %p337_p5  ;;  %s265_s18 = scalar_lea.hbm %s3076_s1, %s2106_s29 }
  0x29   : > { %s254_s12 = scalar_lea.sflag [#allocation3], %s2488_s9  ;;  %s2393_s15 = smov [#allocation2]  }
  0x2a   : > { %s2514_s14 = scalar_lea.hbm %s3089_s3, %s2107_s13  ;;  %s266_s13 = sshll.u32 %s257_s11, 4  ;;  %s267_s13 = int_to_ptr.vmem [resolvable:$true] %s266_s13 }
  0x2b   : > { %s2275_s19 = scalar_lea.vmem %s267_s13, 1024  ;;  %s2280_s2 = sshll.u32 %s2393_s15, 4  ;;  %s2281_s2 = int_to_ptr.vmem [resolvable:$false] %s2280_s2 }
  0x2c   : > { %p2276_p8 = scmp.ne.s32.totalorder %s267_s13, %s2275_s19  ;;  %s2282_s3 = scalar_lea.vmem %s2281_s2, 2048 }
  0x2d   : > { %p2283_p13 = scmp.lt.s32.totalorder %s267_s13, %s2281_s2  ;;  %p2284_p0 = scmp.lt.s32.totalorder %s2282_s3, %s2275_s19 }
  0x2e   : > { %p2278_p11 = pnand %p2276_p8, %p2236_p10 }
  0x2f   : > { %p2285_p1 = por %p2284_p0, %p2283_p13 }
  0x30   : > { %p2279_p12 = pneg %p2278_p11 }
  0x32   : > { %p2286_p2 = pnand %p2285_p1, %p2279_p12 }
  0x34   : > { %2289 = shalt.err (!%p2286_p2)
}
  0x35   : > { %s2394_s29 = smov 128   ;;  %s2395_s9 = smov 8  }
  0x36   : > { %2127 = dma.hbm_to_vmem [thread:$0]  (!%p2490_p9), %s265_s18, 1024, %s267_s13, %s254_s12, %s2394_s29, %s2394_s29, %s2395_s9  }
  0x37   : > { %s2303_s21 = scalar_lea.vmem %s2517_s28, 640  ;;  %s2396_s2 = smov [#allocation7]  }
  0x38   : > { %p2304_p3 = scmp.ne.s32.totalorder %s2517_s28, %s2303_s21  ;;  %s2308_s3 = sshll.u32 %s2396_s2, 4  ;;  %s2309_s3 = int_to_ptr.vmem [resolvable:$false] %s2308_s3 }
  0x39   : > { %s2310_s30 = scalar_lea.vmem %s2309_s3, 1280  ;;  %p2311_p8 = scmp.lt.s32.totalorder %s2517_s28, %s2309_s3 }
  0x3a   : > { %p2306_p4 = pnand %p2304_p3, %p2236_p10  ;;  %p2312_p11 = scmp.lt.s32.totalorder %s2310_s30, %s2303_s21 }
  0x3c   : > { %p2307_p5 = pneg %p2306_p4  ;;  %p2313_p12 = por %p2312_p11, %p2311_p8 }
  0x3e   : > { %p2314_p13 = pnand %p2313_p12, %p2307_p5 }
  0x40   : > { %2317 = shalt.err (!%p2314_p13)
}
  0x41   : > { %s2397_s16 = smov 256   ;;  %341 = sbr.rel (%p2520_p6) target bundleno = 573 (0x23d), region = 44 }
  0x42   : > { %2133 = dma.hbm_to_vmem [thread:$0]  (!%p2490_p9), %s2514_s14, 640, %s2517_s28, %s2501_s20, %s2397_s16, %s2394_s29, %s2395_s9  }
  0x43   : > { %s2549_s18 = sand.u32 (!%p2520_p6), 1, %s2374_s22  }
  0x44   : > { %s2037_s11 = sshll.u32 (!%p2520_p6), %s2549_s18, 6  ;;  %s344_s13 = scalar_lea.sflag (!%p2520_p6), [#allocation3], %s2549_s18 }
  0x45   : > { %s2553_s12 = scalar_lea.vmem (!%p2520_p6), [#allocation2], %s2037_s11 }
  0x46   : > { %2357 = dma.done.wait (%p2479_p7), %s344_s13, 1024  }
  0x47   : > { %2359 = vsyncadd (%p2479_p7), %s344_s13, 4294966272  ;;  %s352_s10 = sand.u32 1, %s2466_s27   ;;  %s2038_s20 = sshll.u32 %s2549_s18, 3 }
  0x48   : > { %s353_s14 = scalar_lea.sflag [#allocation6], %s352_s10  ;;  %s2561_s28 = scalar_lea.vmem [#allocation5], %s2038_s20 }
  0x49   : > { %2361 = dma.done.wait (%p2479_p7), %s353_s14, 768  }
  0x4a   : > { %2363 = vsyncadd (%p2479_p7), %s353_s14, 4294966528  ;;  %v493_v0 = vlaneseq  ;;  %p421_p9 = scmp.lt.s32.totalorder %s2382_s24, 1  ;;  %v2398_v1 = vmov 1966171168   ;;  %v2399_v3 = vmov 0.0   ;;  %vm461_vm0 = vcmask 1044480  }
  0x4b   : > { %v491_v2 = vunpack.c.l.s4 %v2398_v1  ;;  %624 = vmatprep.mubr.f32.mxu0 %v2399_v3  ;;  %923 = vmatprep.mubr.f32.mxu1 %v2399_v3  ;;  %v463_v7 = vld [vmem:[%s2553_s12] ss:$4 sm:$0x3]  ;;  %v2043_v8 = vld [vmem:[%s2553_s12 + $0x8] ss:$4 sm:$0x3] }
  0x4c   : > { %v2570_v4 = vshrl.u32 %v493_v0, 7  ;;  %s2573_s7 = scalar_select %p421_p9, %s2382_s24, 1  ;;  %v2044_v9 = vld [vmem:[%s2553_s12 + $0x10] ss:$4 sm:$0x3]  ;;  %v486_v11 = vcombine.low %v463_v7, %v2043_v8  ;;  %vm554_vm1 = vcmask 64512  }
  0x4d   : > { %v492_v5 = vunpack.c.0.s8 %v491_v2  ;;  %v2045_v10 = vld [vmem:[%s2553_s12 + $0x18] ss:$4 sm:$0x3]  ;;  %v2046_v12 = vld [vmem:[%s2553_s12 + $0x20] ss:$4 sm:$0x3] }
  0x4e   : > { %s2109_s17 = sshll.u32 %s2573_s7, 3  ;;  %v2047_v13 = vld [vmem:[%s2553_s12 + $0x28] ss:$4 sm:$0x3]  ;;  %v487_v14 = vcombine.low %v2044_v9, %v2045_v10  ;;  %s2111_s9 = smul.u32 40, %s2549_s18 }
  0x4f   : > { %v2576_v6 = vsub.s32 %v492_v5, %v2570_v4  ;;  %v2048_v15 = vld [vmem:[%s2553_s12 + $0x30] ss:$4 sm:$0x3]  ;;  %v2049_v16 = vld [vmem:[%s2553_s12 + $0x38] ss:$4 sm:$0x3]  ;;  %v488_v17 = vcombine.low %v2046_v12, %v2047_v13  ;;  %s436_s29 = scalar_lea.vmem %s3079_s4, %s2109_s17  ;;  %s428_s16 = scalar_lea.vmem %s3075_s0, %s2109_s17 }
  0x50   : > { %v489_v19 = vcombine.low %v2048_v15, %v2049_v16  ;;  %v2056_v21 = vld [vmem:[%s2553_s12 + $0x1] ss:$4 sm:$0x3]  ;;  %v2057_v22 = vld [vmem:[%s2553_s12 + $0x9] ss:$4 sm:$0x3] }
  0x51   : > { %v496_v18 = vrot.slane %v486_v11, %v2576_v6  ;;  %v503_v20 = vrot.slane %v487_v14, %v2576_v6  ;;  %v510_v23 = vrot.slane %v488_v17, %v2576_v6  ;;  %v2058_v24 = vld [vmem:[%s2553_s12 + $0x11] ss:$4 sm:$0x3]  ;;  %v2059_v25 = vld [vmem:[%s2553_s12 + $0x19] ss:$4 sm:$0x3]  ;;  %v791_v26 = vcombine.low %v2056_v21, %v2057_v22 }
  0x52   : > { %v517_v27 = vrot.slane %v489_v19, %v2576_v6  ;;  %v2060_v29 = vld [vmem:[%s2553_s12 + $0x21] ss:$4 sm:$0x3]  ;;  %v2061_v30 = vld [vmem:[%s2553_s12 + $0x29] ss:$4 sm:$0x3]  ;;  %v792_v31 = vcombine.low %v2058_v24, %v2059_v25 }
  0x53   : > { %v519_v28 = vcombine.high %v496_v18, %v503_v20  ;;  %v518_v32 = vcombine.low %v496_v18, %v503_v20  ;;  %v2062_v33 = vld [vmem:[%s2553_s12 + $0x31] ss:$4 sm:$0x3]  ;;  %v2063_v34 = vld [vmem:[%s2553_s12 + $0x39] ss:$4 sm:$0x3]  ;;  %v793_v35 = vcombine.low %v2060_v29, %v2061_v30  ;;  %v801_v36 = vrot.slane %v791_v26, %v2576_v6 }
  0x54   : > { %v521_v37 = vcombine.high %v510_v23, %v517_v27  ;;  %v794_v39 = vcombine.low %v2062_v33, %v2063_v34  ;;  %v808_v40 = vrot.slane %v792_v31, %v2576_v6  ;;  %v456_v41 = vld [vmem:[%s436_s29] sm:$0x1f]  ;;  %v520_v43 = vcombine.low %v510_v23, %v517_v27  ;;  %v2072_v51 = vld [vmem:[%s2553_s12 + $0xa] ss:$4 sm:$0x3]  ;;  %s2678_s21 = scalar_lea.vmem [#allocation7], %s2111_s9 }
  0x55   : > { %v535_v38 = vrot.slane %v519_v28, %v2576_v6  ;;  %v815_v42 = vrot.slane %v793_v35, %v2576_v6  ;;  %v528_v44 = vrot.slane %v518_v32, %v2576_v6  ;;  %v457_v45 = vsub.f32 0.0, %v456_v41  ;;  %v2071_v46 = vld [vmem:[%s2553_s12 + $0x2] ss:$4 sm:$0x3]  ;;  %s2042_s2 = sshll.u32 %s2573_s7, 1  ;;  %s1864_s14 = sshll.u32 %s3081_s6, 4  ;;  %s1865_s14 = int_to_ptr.vmem [resolvable:$true] %s1864_s14 }
  0x56   : > { %v549_v47 = vrot.slane %v521_v37, %v2576_v6  ;;  %v822_v48 = vrot.slane %v794_v39, %v2576_v6  ;;  %v824_v49 = vcombine.high %v801_v36, %v808_v40  ;;  %v823_v50 = vcombine.low %v801_v36, %v808_v40  ;;  %v2073_v52 = vld [vmem:[%s2553_s12 + $0x12] ss:$4 sm:$0x3]  ;;  %v2074_v55 = vld [vmem:[%s2553_s12 + $0x1a] ss:$4 sm:$0x3]  ;;  %s444_s13 = scalar_lea.vmem %s3080_s5, %s2042_s2  ;;  %p2325_p1 = scmp.lt.s32.totalorder %s1865_s14, %s1865_s14 }
  0x57   : > { %v542_v53 = vrot.slane %v520_v43, %v2576_v6  ;;  %v2615_v54 = vrot.slane %v457_v45, 3  ;;  %v1089_v56 = vcombine.low %v2071_v46, %v2072_v51  ;;  %v2075_v61 = vld [vmem:[%s2553_s12 + $0x22] ss:$4 sm:$0x3]  ;;  %v1090_v7 = vcombine.low %v2073_v52, %v2074_v55  ;;  %p2135_p7 = scmp.eq.s32.totalorder %s2466_s27, 1  ;;  %s2318_s17 = scalar_lea.vmem %s1865_s14, 32 }
  0x58   : > { %v551_v57 = vcombine.low %v535_v38, %v549_v47  ;;  %v826_v58 = vcombine.high %v815_v42, %v822_v48  ;;  %v840_v59 = vrot.slane %v824_v49, %v2576_v6  ;;  %v825_v60 = vcombine.low %v815_v42, %v822_v48  ;;  %v2076_v62 = vld [vmem:[%s2553_s12 + $0x2a] ss:$4 sm:$0x3]  ;;  %v2077_v2 = vld [vmem:[%s2553_s12 + $0x32] ss:$4 sm:$0x3]  ;;  %p2319_p10 = scmp.ne.s32.totalorder %s1865_s14, %s2318_s17  ;;  %p2326_p2 = scmp.lt.s32.totalorder %s2318_s17, %s2318_s17 }
  0x59   : > { %v550_v63 = vcombine.low %v528_v44, %v542_v53  ;;  %v833_v0 = vrot.slane %v823_v50, %v2576_v6  ;;  %v2624_v1 = vsel %vm461_vm0, %v456_v41, %v2615_v54  ;;  %v2078_v5 = vld [vmem:[%s2553_s12 + $0x3a] ss:$4 sm:$0x3]  ;;  %v1091_v10 = vcombine.low %v2075_v61, %v2076_v62  ;;  %v2086_v12 = vld [vmem:[%s2553_s12 + $0x3] ss:$4 sm:$0x3] }
  0x5a   : > { %590 = vmatprep.subr.mxu0 %v551_v57  ;;  %v854_v8 = vrot.slane %v826_v58, %v2576_v6  ;;  %v847_v9 = vrot.slane %v825_v60, %v2576_v6  ;;  %v1092_v11 = vcombine.low %v2077_v2, %v2078_v5  ;;  %v2087_v13 = vld [vmem:[%s2553_s12 + $0xb] ss:$4 sm:$0x3]  ;;  %v1099_v14 = vrot.slane %v1089_v56, %v2576_v6  ;;  %v2088_v16 = vld [vmem:[%s2553_s12 + $0x13] ss:$4 sm:$0x3]  ;;  %p2320_p6 = pnand %p2319_p10, %p2135_p7  ;;  %p2327_p3 = por %p2326_p2, %p2325_p1 }
  0x5b   : > { %591 = vmatpush1.msra.mxu0 %v550_v63  ;;  %v1106_v15 = vrot.slane %v1090_v7, %v2576_v6  ;;  %v2089_v17 = vld [vmem:[%s2553_s12 + $0x1b] ss:$4 sm:$0x3]  ;;  %v1387_v18 = vcombine.low %v2086_v12, %v2087_v13  ;;  %v1113_v21 = vrot.slane %v1091_v10, %v2576_v6  ;;  %v2090_v23 = vld [vmem:[%s2553_s12 + $0x23] ss:$4 sm:$0x3] }
  0x5c   : > { %v856_v19 = vcombine.low %v840_v59, %v854_v8  ;;  %v855_v20 = vcombine.low %v833_v0, %v847_v9  ;;  %2050 = vmatmul.mubr.msk.f32.vlgmr.msra.gmra.mxu0 %vm554_vm1, %v2624_v1  ;;  %v1120_v22 = vrot.slane %v1092_v11, %v2576_v6  ;;  %v2091_v24 = vld [vmem:[%s2553_s12 + $0x2b] ss:$4 sm:$0x3]  ;;  %v2092_v27 = vld [vmem:[%s2553_s12 + $0x33] ss:$4 sm:$0x3]  ;;  %v1388_v29 = vcombine.low %v2088_v16, %v2089_v17  ;;  %p2321_p0 = pneg %p2320_p6 }
  0x5d   : > { %v1122_v25 = vcombine.high %v1099_v14, %v1106_v15  ;;  %v1121_v26 = vcombine.low %v1099_v14, %v1106_v15  ;;  %v2093_v28 = vld [vmem:[%s2553_s12 + $0x3b] ss:$4 sm:$0x3]  ;;  %v1389_v30 = vcombine.low %v2090_v23, %v2091_v24  ;;  %630 = vmatprep.mubr.f32.mxu0 %v2399_v3  ;;  %v1397_v34 = vrot.slane %v1387_v18, %v2576_v6  ;;  %v447_v55 = vld [vmem:[%s2561_s28] sm:$0xff]  ;;  %s2101_s12 = sshll.u32 %s2382_s24, 7 }
  0x5e   : > { %889 = vmatprep.subr.mxu1 %v856_v19  ;;  %v1124_v31 = vcombine.high %v1113_v21, %v1120_v22  ;;  %v1123_v32 = vcombine.low %v1113_v21, %v1120_v22  ;;  %v1390_v33 = vcombine.low %v2092_v27, %v2093_v28  ;;  %v1404_v37 = vrot.slane %v1388_v29, %v2576_v6  ;;  %v637_v56 = vld [vmem:[%s2678_s21] ss:$4 sm:$0x3]  ;;  %v2052_v57 = vld [vmem:[%s2678_s21 + $0x8] ss:$4 sm:$0x3]  ;;  %p2328_p4 = pnand %p2327_p3, %p2321_p0 }
  0x5f   : > { %890 = vmatpush1.msra.mxu1 %v855_v20  ;;  %v1138_v35 = vrot.slane %v1122_v25, %v2576_v6  ;;  %v1131_v36 = vrot.slane %v1121_v26, %v2576_v6  ;;  %v1411_v38 = vrot.slane %v1389_v30, %v2576_v6  ;;  %2192 = vrsqrt.f32 %v447_v55  ;;  %v2054_v58 = vld [vmem:[%s2678_s21 + $0x18] ss:$4 sm:$0x3]  ;;  %v2066_v61 = vld [vmem:[%s2678_s21 + $0x1] ss:$4 sm:$0x3] }
  0x60   : > { %2064 = vmatmul.mubr.msk.f32.vlgmr.msra.gmra.mxu1 %vm554_vm1, %v2624_v1  ;;  %v1152_v39 = vrot.slane %v1124_v31, %v2576_v6  ;;  %v1145_v40 = vrot.slane %v1123_v32, %v2576_v6  ;;  %v1418_v41 = vrot.slane %v1390_v33, %v2576_v6  ;;  %2051 = vmatmul.mubr.msk.f32.gmra.mxu0 %vm554_vm1, %v2615_v54  ;;  %v2067_v62 = vld [vmem:[%s2678_s21 + $0x9] ss:$4 sm:$0x3]  ;;  %v2068_v0 = vld [vmem:[%s2678_s21 + $0x11] ss:$4 sm:$0x3] }
  0x61   : > { %v1420_v42 = vcombine.high %v1397_v34, %v1404_v37  ;;  %929 = vmatprep.mubr.f32.mxu1 %v2399_v3  ;;  %v1419_v43 = vcombine.low %v1397_v34, %v1404_v37  ;;  %1221 = vmatprep.mubr.f32.mxu0 %v2399_v3  ;;  %vm450_vm2 = vcmp.eq.f32.partialorder %v447_v55, inf  ;;  %v453_v7 = vand.u32 2147483648, %v447_v55  ;;  %v2055_v8 = vld [vmem:[%s2678_s21 + $0x20] ss:$4 sm:$0x3]  ;;  %v2721_v29 = vld [vmem:[%s428_s16] sm:$0xff] }
  0x62   : > { %v1154_v44 = vcombine.low %v1138_v35, %v1152_v39  ;;  %v1153_v45 = vcombine.low %v1131_v36, %v1145_v40  ;;  %v1422_v46 = vcombine.high %v1411_v38, %v1418_v41  ;;  %v1421_v47 = vcombine.low %v1411_v38, %v1418_v41  ;;  %v2070_v18 = vld [vmem:[%s2678_s21 + $0x21] ss:$4 sm:$0x3]  ;;  %v2081_v20 = vld [vmem:[%s2678_s21 + $0x2] ss:$4 sm:$0x3] }
  0x63   : > { %v1436_v48 = vrot.slane %v1420_v42, %v2576_v6  ;;  %v1429_v49 = vrot.slane %v1419_v43, %v2576_v6  ;;  %v969_v9 = vcombine.low %v2066_v61, %v2067_v62  ;;  %vm452_vm3 = vcmp.eq.f32.partialorder %v447_v55, 0.0  ;;  %v2082_v21 = vld [vmem:[%s2678_s21 + $0xa] ss:$4 sm:$0x3]  ;;  %v2723_v30 = vld [vmem:[%s444_s13] sm:$0x3] }
  0x64   : > { %1187 = vmatprep.subr.mxu0 %v1154_v44  ;;  %v1450_v50 = vrot.slane %v1422_v46, %v2576_v6  ;;  %v1443_v51 = vrot.slane %v1421_v47, %v2576_v6  ;;  %2065 = vmatmul.mubr.msk.f32.gmra.mxu1 %vm554_vm1, %v2615_v54  ;;  %v2692_v12 = vsub.s32 0, %v2570_v4  ;;  %v692_v13 = vrot.slane %v2055_v8, %v2576_v6  ;;  %v2083_v25 = vld [vmem:[%s2678_s21 + $0x12] ss:$4 sm:$0x3]  ;;  %s1855_s7 = scalar_lea.smem [#allocation8], %s2101_s12 }
  0x65   : > { %1188 = vmatpush1.msra.mxu0 %v1153_v45  ;;  %1519 = vmatprep.mubr.f32.mxu1 %v2399_v3  ;;  %v977_v16 = vrot.slane %v969_v9, %v2576_v6  ;;  %v2702_v19 = vsub.s32 1, %v2570_v4  ;;  %v2084_v26 = vld [vmem:[%s2678_s21 + $0x1a] ss:$4 sm:$0x3]  ;;  %v991_v27 = vrot.slane %v2070_v18, %v2576_v6  ;;  %v653_v32 = vsub.s32 4, %v2570_v4 }
  0x66   : > { %v1452_v52 = vcombine.low %v1436_v48, %v1450_v50  ;;  %v1451_v53 = vcombine.low %v1429_v49, %v1443_v51  ;;  %2079 = vmatmul.mubr.msk.f32.vlgmr.msra.gmra.mxu0 %vm554_vm1, %v2624_v1  ;;  %v716_v24 = vrot.slane %v692_v13, %v2576_v6  ;;  %v1267_v33 = vcombine.low %v2081_v20, %v2082_v21  ;;  %v2096_v35 = vld [vmem:[%s2678_s21 + $0x3] ss:$4 sm:$0x3]  ;;  %v2097_v40 = vld [vmem:[%s2678_s21 + $0xb] ss:$4 sm:$0x3] }
  0x67   : > { %1227 = vmatprep.mubr.f32.mxu0 %v2399_v3  ;;  %v1268_v34 = vcombine.low %v2083_v25, %v2084_v26  ;;  %v952_v39 = vsub.s32 5, %v2570_v4  ;;  %v744_v41 = vrot.slane %v2721_v29, %v2692_v12  ;;  %v1015_v43 = vrot.slane %v991_v27, %v2576_v6  ;;  %v2098_v45 = vld [vmem:[%s2678_s21 + $0x13] ss:$4 sm:$0x3] }
  0x68   : > { %1485 = vmatprep.subr.mxu1 %v1452_v52  ;;  %v695_v44 = vcombine.high %v692_v13, %v692_v13  ;;  %v2099_v46 = vld [vmem:[%s2678_s21 + $0x1b] ss:$4 sm:$0x3]  ;;  %vm1689_vm4 = vcmp.eq.s32.totalorder %v2723_v30, 0  ;;  %v994_v48 = vcombine.high %v991_v27, %v991_v27  ;;  %v1275_v51 = vrot.slane %v1267_v33, %v2576_v6 }
  0x69   : > { %1486 = vmatpush1.msra.mxu1 %v1451_v53  ;;  %v1282_v52 = vrot.slane %v1268_v34, %v2576_v6  ;;  %v2754_v62 = vrot.slane %v744_v41, %v2692_v12  ;;  %v2100_v9 = vld [vmem:[%s2678_s21 + $0x23] ss:$4 sm:$0x3]  ;;  %v748_v20 = vrot.slane %v2721_v29, %v653_v32  ;;  %vm1725_vm5 = vcmp.eq.s32.totalorder %v2723_v30, 1 }
  0x6a   : > { %2094 = vmatmul.mubr.msk.f32.vlgmr.msra.gmra.mxu1 %vm554_vm1, %v2624_v1  ;;  %2080 = vmatmul.mubr.msk.f32.gmra.mxu0 %vm554_vm1, %v2615_v54  ;;  %v2069_v1 = vld [vmem:[%s2678_s21 + $0x19] ss:$4 sm:$0x3]  ;;  %v723_v61 = vrot.slane %v695_v44, %v2576_v6  ;;  %v2784_v27 = vsub.s32 3, %v2570_v4  ;;  %vm1761_vm7 = vcmp.eq.s32.totalorder %v2723_v30, 2  ;;  %vm1797_vm9 = vcmp.eq.s32.totalorder %v2723_v30, 3 }
  0x6b   : > { %1525 = vmatprep.mubr.f32.mxu1 %v2399_v3  ;;  %v2053_v3 = vld [vmem:[%s2678_s21 + $0x10] ss:$4 sm:$0x3]  ;;  %v970_v10 = vcombine.low %v2068_v0, %v2069_v1  ;;  %v1022_v1 = vrot.slane %v994_v48, %v2576_v6  ;;  %v1290_v8 = vcombine.low %v1275_v51, %v1282_v52 }
  0x6c   : > { %v2193_v59 = vpop.eup %2192  ;;  %v671_v60 = vcombine.low %v2053_v3, %v2054_v58  ;;  %v1566_v3 = vcombine.low %v2098_v45, %v2099_v46  ;;  %v2400_v58 = vmov 0  }
  0x6d   : > { %v449_v63 = vmul.f32 %v2193_v59, %v447_v55  ;;  %v984_v17 = vrot.slane %v970_v10, %v2576_v6  ;;  %v2748_v59 = vsel %vm1689_vm4, 1, %v2400_v58  ;;  %v1299_v25 = vrot.slane %v1290_v8, %v2576_v6 }
  0x6e   : > { %2095 = vmatmul.mubr.msk.f32.gmra.mxu1 %vm554_vm1, %v2615_v54  ;;  %v670_v54 = vcombine.low %v637_v56, %v2052_v57  ;;  %v685_v5 = vrot.slane %v671_v60, %v2576_v6  ;;  %v2085_v56 = vld [vmem:[%s2678_s21 + $0x22] ss:$4 sm:$0x3]  ;;  %v1565_v57 = vcombine.low %v2096_v35, %v2097_v40  ;;  %v1042_v60 = vrot.slane %v2721_v29, %v2702_v19 }
  0x6f   : > { %v451_v11 = vsel %vm450_vm2, %v447_v55, %v449_v63  ;;  %v992_v28 = vcombine.low %v977_v16, %v984_v17  ;;  %v993_v47 = vcombine.high %v977_v16, %v984_v17  ;;  %v1548_v40 = vsub.s32 7, %v2570_v4 }
  0x70   : > { %v678_v2 = vrot.slane %v670_v54, %v2576_v6  ;;  %v2696_v15 = vsel %vm452_vm3, %v453_v7, %v451_v11  ;;  %v1289_v7 = vrot.slane %v2085_v56, %v2576_v6  ;;  %v1694_v11 = vrot.slane %v2748_v59, %v2692_v12 }
  0x71   : > { %v650_v22 = vrot.slane %v2696_v15, %v2692_v12  ;;  %v949_v31 = vrot.slane %v2696_v15, %v2702_v19  ;;  %v1001_v42 = vrot.slane %v992_v28, %v2576_v6  ;;  %v654_v50 = vrot.slane %v2696_v15, %v653_v32 }
  0x72   : > { %v693_v14 = vcombine.low %v678_v2, %v685_v5  ;;  %v694_v38 = vcombine.high %v678_v2, %v685_v5  ;;  %v953_v63 = vrot.slane %v2696_v15, %v952_v39  ;;  %v1008_v0 = vrot.slane %v993_v47, %v2576_v6 }
  0x73   : > { %v660_v36 = vrot.slane %v650_v22, %v2692_v12  ;;  %v959_v49 = vrot.slane %v949_v31, %v2702_v19  ;;  %v1023_v54 = vcombine.low %v1001_v42, %v1015_v43  ;;  %v664_v2 = vrot.slane %v654_v50, %v2692_v12 }
  0x74   : > { %v702_v23 = vrot.slane %v693_v14, %v2576_v6  ;;  %v709_v55 = vrot.slane %v694_v38, %v2576_v6  ;;  %v2763_v5 = vsub.s32 2, %v2570_v4  ;;  %v1573_v13 = vrot.slane %v1565_v57, %v2576_v6 }
  0x75   : > { %v1580_v14 = vrot.slane %v1566_v3, %v2576_v6  ;;  %v1027_v16 = vmul.f32 %v1023_v54, %v959_v49  ;;  %v2773_v17 = vrot.slane %v1042_v60, %v2702_v19  ;;  %v963_v21 = vrot.slane %v953_v63, %v2702_v19 }
  0x76   : > { %v724_v37 = vcombine.low %v702_v23, %v716_v24  ;;  %v725_v18 = vcombine.low %v709_v55, %v723_v61  ;;  %v1024_v22 = vcombine.low %v1008_v0, %v1022_v1  ;;  %v1587_v23 = vrot.slane %v2100_v9, %v2576_v6 }
  0x77   : > { %v1247_v24 = vrot.slane %v2696_v15, %v2763_v5  ;;  %v1313_v26 = vrot.slane %v1289_v7, %v2576_v6  ;;  %v1588_v28 = vcombine.low %v1573_v13, %v1580_v14  ;;  %v1250_v31 = vsub.s32 6, %v2570_v4 }
  0x78   : > { %v2743_v53 = vmul.f32 %v724_v37, %v660_v36  ;;  %v1291_v32 = vcombine.high %v1275_v51, %v1282_v52  ;;  %v1292_v33 = vcombine.high %v1289_v7, %v1289_v7  ;;  %v1029_v35 = vsub.f32 0.0, %v1027_v16 }
  0x79   : > { %v1726_v36 = vsel %vm1725_vm5, 1, %v2400_v58  ;;  %v729_v37 = vmul.f32 %v725_v18, %v664_v2  ;;  %v1028_v38 = vmul.f32 %v1024_v22, %v963_v21  ;;  %v1589_v41 = vcombine.high %v1573_v13, %v1580_v14 }
  0x7a   : > { %v730_v10 = vsub.f32 0.0, %v2743_v53  ;;  %v1590_v42 = vcombine.high %v1587_v23, %v1587_v23  ;;  %v1257_v43 = vrot.slane %v1247_v24, %v2763_v5  ;;  %v1321_v44 = vcombine.low %v1299_v25, %v1313_v26 }
  0x7b   : > { %v1545_v45 = vrot.slane %v2696_v15, %v2784_v27  ;;  %v1611_v46 = vrot.slane %v1587_v23, %v2576_v6  ;;  %v1597_v47 = vrot.slane %v1588_v28, %v2576_v6  ;;  %v1251_v48 = vrot.slane %v2696_v15, %v1250_v31 }
  0x7c   : > { %v2787_v34 = vrot.slane %v730_v10, 3  ;;  %v1306_v49 = vrot.slane %v1291_v32, %v2576_v6  ;;  %v1320_v50 = vrot.slane %v1292_v33, %v2576_v6  ;;  %v2799_v51 = vrot.slane %v1029_v35, 3 }
  0x7d   : > { %v1730_v52 = vrot.slane %v1726_v36, %v2692_v12  ;;  %v731_v55 = vsub.f32 0.0, %v729_v37  ;;  %v1046_v56 = vrot.slane %v2721_v29, %v952_v39  ;;  %vm2805_vm6 = vcmp.eq.s32.totalorder %v1694_v11, 1 }
  0x7e   : > { %v1698_v3 = vrot.slane %v2748_v59, %v2702_v19  ;;  %v1549_v54 = vrot.slane %v2696_v15, %v1548_v40  ;;  %v1604_v60 = vrot.slane %v1589_v41, %v2576_v6  ;;  %v1618_v61 = vrot.slane %v1590_v42, %v2576_v6 }
  0x7f   : > { %v1030_v63 = vsub.f32 0.0, %v1028_v38  ;;  %v1734_v0 = vrot.slane %v1726_v36, %v2702_v19  ;;  %v1555_v39 = vrot.slane %v1545_v45, %v2784_v27  ;;  %v1325_v1 = vmul.f32 %v1321_v44, %v1257_v43 }
  0x80   : > { %v1619_v2 = vcombine.low %v1597_v47, %v1611_v46  ;;  %v1261_v7 = vrot.slane %v1251_v48, %v2763_v5  ;;  %v1322_v59 = vcombine.low %v1306_v49, %v1320_v50  ;;  %v738_v15 = vsel %vm461_vm0, %v2743_v53, %v2787_v34 }
  0x81   : > { %v2823_v8 = vrot.slane %v731_v55, 3  ;;  %v758_v6 = vrot.slane %v748_v20, %v2692_v12  ;;  %v1340_v9 = vrot.slane %v2721_v29, %v2763_v5  ;;  %vm2828_vm8 = vcmp.eq.s32.totalorder %v1730_v52, 1 }
  0x82   : > { %v1762_v11 = vsel %vm1761_vm7, 1, %v2400_v58  ;;  %v1559_v13 = vrot.slane %v1549_v54, %v2784_v27  ;;  %v1620_v14 = vcombine.low %v1604_v60, %v1618_v61  ;;  %v1037_v53 = vsel %vm461_vm0, %v1027_v16, %v2799_v51 }
  0x83   : > { %vm2837_vm10 = vcmp.eq.s32.totalorder %v1698_v3, 1  ;;  %v2841_v20 = vrot.slane %v1030_v63, 3  ;;  %v1056_v21 = vrot.slane %v1046_v56, %v2702_v19  ;;  %vm2844_vm11 = vcmp.eq.s32.totalorder %v1734_v0, 1 }
  0x84   : > { %v1327_v30 = vsub.f32 0.0, %v1325_v1  ;;  %v2848_v24 = vmul.f32 %v1619_v2, %v1555_v39  ;;  %v1326_v25 = vmul.f32 %v1322_v59, %v1261_v7  ;;  %v739_v16 = vsel %vm461_vm0, %v729_v37, %v2823_v8 }
  0x85   : > { %v1766_v28 = vrot.slane %v1762_v11, %v2692_v12  ;;  %v2855_v32 = vsel %vm1797_vm9, 1, %v2400_v58  ;;  %v2858_v35 = vrot.slane %v1340_v9, %v2763_v5  ;;  %v1638_v36 = vrot.slane %v2721_v29, %v2784_v27 }
  0x86   : > { %v1344_v41 = vrot.slane %v2721_v29, %v1250_v31  ;;  %v1624_v42 = vmul.f32 %v1620_v14, %v1559_v13  ;;  %v1038_v37 = vsel %vm461_vm0, %v1028_v38, %v2841_v20  ;;  %v1770_v45 = vrot.slane %v1762_v11, %v2702_v19 }
  0x87   : > { %v2868_v47 = vrot.slane %v1327_v30, 3  ;;  %v1625_v48 = vsub.f32 0.0, %v2848_v24  ;;  %v1802_v49 = vrot.slane %v2855_v32, %v2692_v12  ;;  %v1328_v50 = vsub.f32 0.0, %v1326_v25 }
  0x88   : > { %vm2880_vm12 = vcmp.eq.s32.totalorder %v1766_v28, 1  ;;  %v2885_v60 = vrot.slane %v1638_v36, %v2784_v27  ;;  %v1354_v12 = vrot.slane %v1344_v41, %v2763_v5  ;;  %v1626_v61 = vsub.f32 0.0, %v1624_v42 }
  0x89   : > { %v1642_v63 = vrot.slane %v2721_v29, %v1548_v40  ;;  %vm2899_vm13 = vcmp.eq.s32.totalorder %v1770_v45, 1  ;;  %v1335_v4 = vsel %vm461_vm0, %v1325_v1, %v2868_v47  ;;  %v1332_v29 = vrot.slane %v1328_v50, 3 }
  0x8a   : > { %v1806_v40 = vrot.slane %v2855_v32, %v2702_v19  ;;  %v2915_v11 = vrot.slane %v1625_v48, 3  ;;  %vm2917_vm14 = vcmp.eq.s32.totalorder %v1802_v49, 1 }
  0x8c   : > { %v1633_v18 = vsel %vm461_vm0, %v2848_v24, %v2915_v11  ;;  %vm2954_vm15 = vcmp.eq.s32.totalorder %v1806_v40, 1 }
 0x11c   : > { %v626_v22 = vpop.f32.mrf.mxu0 }
 0x11d   : > { %v759_v26 = vadd.f32 %v2754_v62, %v626_v22  ;;  %v2925_v22 = vrot.slane %v1626_v61, 3 }
 0x11e   : > { %v628_v33 = vpop.f32.mrf.mxu0 }
 0x11f   : > { %v2863_v43 = vadd.f32 %v759_v26, %v738_v15  ;;  %v760_v44 = vadd.f32 %v758_v6, %v628_v33  ;;  %v1336_v33 = vsel %vm461_vm0, %v1326_v25, %v1332_v29  ;;  %v1634_v25 = vsel %vm461_vm0, %v1624_v42, %v2925_v22 }
 0x120   : > { %v925_v58 = vpop.f32.mrf.mxu1  ;;  %v632_v46 = vpop.f32.mrf.mxu0  ;;  %vm1834_vm0 = vcmask 1041408  }
 0x121   : > { %v1701_v31 = vsel %vm2805_vm6, %v2863_v43, 0.0  ;;  %v1057_v52 = vadd.f32 %v2773_v17, %v925_v58  ;;  %v2877_v55 = vadd.f32 %v760_v44, %v739_v16  ;;  %v761_v38 = vadd.f32 %v2754_v62, %v632_v46 }
 0x122   : > { %v927_v3 = vpop.f32.mrf.mxu1  ;;  %v634_v54 = vpop.f32.mrf.mxu0  ;;  %v2932_v16 = vrot.slane %v1642_v63, %v2784_v27 }
 0x123   : > { %v2891_v0 = vadd.f32 %v1057_v52, %v1037_v53  ;;  %v1702_v62 = vsel %vm2837_vm10, %v2877_v55, 0.0  ;;  %v1058_v39 = vadd.f32 %v1056_v21, %v927_v3  ;;  %v2897_v2 = vadd.f32 %v761_v38, %v2787_v34 }
 0x124   : > { %v931_v5 = vpop.f32.mrf.mxu1  ;;  %v762_v59 = vadd.f32 %v758_v6, %v634_v54 }
 0x125   : > { %v1737_v15 = vsel %vm2828_vm8, %v2891_v0, 0.0  ;;  %v2910_v9 = vadd.f32 %v1058_v39, %v1038_v37  ;;  %v1703_v34 = vsel %vm2805_vm6, %v2897_v2, 0.0  ;;  %v1059_v13 = vadd.f32 %v2773_v17, %v931_v5 }
 0x126   : > { %v1741_v1 = vadd.f32 %v1737_v15, %v1701_v31  ;;  %v2923_v19 = vadd.f32 %v762_v59, %v2823_v8  ;;  %v933_v14 = vpop.f32.mrf.mxu1  ;;  %v1223_v53 = vpop.f32.mrf.mxu0  ;;  %v1661_v36 = vmax.f32 %v2863_v43, %v2891_v0 }
 0x127   : > { %v1738_v57 = vsel %vm2844_vm11, %v2910_v9, 0.0  ;;  %v1060_v30 = vadd.f32 %v1056_v21, %v933_v14  ;;  %v1355_v26 = vadd.f32 %v2858_v35, %v1223_v53  ;;  %v2935_v17 = vadd.f32 %v1059_v13, %v2799_v51 }
 0x128   : > { %v1742_v28 = vadd.f32 %v1738_v57, %v1702_v62  ;;  %v1704_v8 = vsel %vm2837_vm10, %v2923_v19, 0.0  ;;  %v1225_v32 = vpop.f32.mrf.mxu0  ;;  %v1662_v45 = vmax.f32 %v2877_v55, %v2910_v9 }
 0x129   : > { %v2944_v21 = vadd.f32 %v1060_v30, %v2841_v20  ;;  %v1359_v41 = vadd.f32 %v1355_v26, %v1335_v4  ;;  %v1356_v27 = vadd.f32 %v1354_v12, %v1225_v32  ;;  %v1739_v51 = vsel %vm2828_vm8, %v2935_v17, 0.0 }
 0x12a   : > { %v1521_v44 = vpop.f32.mrf.mxu1  ;;  %v1229_v20 = vpop.f32.mrf.mxu0  ;;  %v1743_v58 = vadd.f32 %v1739_v51, %v1703_v34  ;;  %v1663_v23 = vmax.f32 %v2897_v2, %v2935_v17 }
 0x12b   : > { %v1740_v10 = vsel %vm2844_vm11, %v2944_v21, 0.0  ;;  %v1665_v46 = vmax.f32 %v1661_v36, %v1359_v41  ;;  %v1773_v24 = vsel %vm2880_vm12, %v1359_v41, 0.0  ;;  %v1653_v42 = vadd.f32 %v2885_v60, %v1521_v44 }
 0x12c   : > { %v1744_v48 = vadd.f32 %v1740_v10, %v1704_v8  ;;  %v1360_v49 = vadd.f32 %v1356_v27, %v1336_v33  ;;  %v1523_v50 = vpop.f32.mrf.mxu1  ;;  %v1231_v31 = vpop.f32.mrf.mxu0  ;;  %v1777_v52 = vadd.f32 %v1773_v24, %v1741_v1  ;;  %v1357_v3 = vadd.f32 %v2858_v35, %v1229_v20 }
 0x12d   : > { %v1654_v38 = vadd.f32 %v2932_v16, %v1523_v50  ;;  %v1358_v54 = vadd.f32 %v1354_v12, %v1231_v31  ;;  %v1657_v61 = vadd.f32 %v1653_v42, %v1633_v18  ;;  %v1664_v39 = vmax.f32 %v2923_v19, %v2944_v21 }
 0x12e   : > { %v1666_v63 = vmax.f32 %v1662_v45, %v1360_v49  ;;  %v1774_v62 = vsel %vm2899_vm13, %v1360_v49, 0.0  ;;  %v1361_v4 = vadd.f32 %v1357_v3, %v2868_v47  ;;  %v1527_v40 = vpop.f32.mrf.mxu1 }
 0x12f   : > { %v1778_v5 = vadd.f32 %v1774_v62, %v1742_v28  ;;  %v1658_v59 = vadd.f32 %v1654_v38, %v1634_v25  ;;  %v2975_v15 = vmax.f32 %v1665_v46, %v1657_v61  ;;  %v1809_v35 = vsel %vm2917_vm14, %v1657_v61, 0.0 }
 0x130   : > { %v1655_v12 = vadd.f32 %v2885_v60, %v1527_v40  ;;  %v2980_v34 = vadd.f32 %v1358_v54, %v1332_v29  ;;  %v1667_v14 = vmax.f32 %v1663_v23, %v1361_v4  ;;  %v1775_v53 = vsel %vm2880_vm12, %v1361_v4, 0.0  ;;  %v1529_v51 = vpop.f32.mrf.mxu1 }
 0x131   : > { %v2982_v1 = vmax.f32 %v1666_v63, %v1658_v59  ;;  %v1810_v13 = vsel %vm2954_vm15, %v1658_v59, 0.0  ;;  %v1673_v47 = vsub.f32 %v2863_v43, %v2975_v15  ;;  %v1709_v57 = vsub.f32 %v2891_v0, %v2975_v15 }
 0x132   : > { %v1745_v30 = vsub.f32 %v1359_v41, %v2975_v15  ;;  %v1781_v60 = vsub.f32 %v1657_v61, %v2975_v15  ;;  %v1779_v33 = vadd.f32 %v1775_v53, %v1743_v58  ;;  %v1659_v41 = vadd.f32 %v1655_v12, %v2915_v11 }
 0x133   : > { %v1674_v29 = vsub.f32 %v2877_v55, %v2982_v1  ;;  %v1710_v26 = vsub.f32 %v2910_v9, %v2982_v1  ;;  %v1746_v28 = vsub.f32 %v1360_v49, %v2982_v1  ;;  %v1782_v56 = vsub.f32 %v1658_v59, %v2982_v1 }
 0x134   : > { %v1677_v8 = vmul.f32 1.442695, %v1673_v47  ;;  %v1713_v32 = vmul.f32 1.442695, %v1709_v57  ;;  %v1749_v43 = vmul.f32 1.442695, %v1745_v30  ;;  %v1668_v18 = vmax.f32 %v1664_v39, %v2980_v34 }
 0x135   : > { %v1785_v36 = vmul.f32 1.442695, %v1781_v60  ;;  %v1679_v0 = vmul.f32 1.442695, %v1674_v29  ;;  %v1715_v27 = vmul.f32 1.442695, %v1710_v26  ;;  %v3002_v9 = vmax.f32 %v1667_v14, %v1659_v41 }
 0x136   : > { %2194 = vpow2.f32 %v1677_v8  ;;  %v1751_v44 = vmul.f32 1.442695, %v1746_v28  ;;  %v1787_v55 = vmul.f32 1.442695, %v1782_v56  ;;  %v1811_v25 = vsel %vm2917_vm14, %v1659_v41, 0.0 }
 0x137   : > { %2196 = vpow2.f32 %v1713_v32  ;;  %v1776_v20 = vsel %vm2899_vm13, %v2980_v34, 0.0  ;;  %v1656_v45 = vadd.f32 %v2932_v16, %v1529_v51  ;;  %v3010_v58 = vadd.f32 %v1809_v35, %v1777_v52 }
 0x138   : > { %2198 = vpow2.f32 %v1749_v43  ;;  %v1780_v11 = vadd.f32 %v1776_v20, %v1744_v48  ;;  %v1675_v10 = vsub.f32 %v2897_v2, %v3002_v9  ;;  %v1711_v46 = vsub.f32 %v2935_v17, %v3002_v9 }
 0x139   : > { %2200 = vpow2.f32 %v1785_v36  ;;  %v1747_v6 = vsub.f32 %v1361_v4, %v3002_v9  ;;  %v1783_v24 = vsub.f32 %v1659_v41, %v3002_v9  ;;  %v1660_v7 = vadd.f32 %v1656_v45, %v2925_v22 }
 0x13a   : > { %2202 = vpow2.f32 %v1679_v0  ;;  %v3019_v42 = vadd.f32 %v1810_v13, %v1778_v5  ;;  %v1681_v16 = vmul.f32 1.442695, %v1675_v10  ;;  %v1717_v48 = vmul.f32 1.442695, %v1711_v46 }
 0x13b   : > { %2204 = vpow2.f32 %v1715_v27  ;;  %v1753_v49 = vmul.f32 1.442695, %v1747_v6  ;;  %v3021_v50 = vmax.f32 %v1668_v18, %v1660_v7  ;;  %v1812_v2 = vsel %vm2954_vm15, %v1660_v7, 0.0 }
 0x13c   : > { %2206 = vpow2.f32 %v1751_v44  ;;  %v1789_v17 = vmul.f32 1.442695, %v1783_v24  ;;  %v3025_v31 = vadd.f32 %v1811_v25, %v1779_v33  ;;  %v3027_v52 = vadd.f32 %v1812_v2, %v1780_v11 }
 0x13d   : > { %2208 = vpow2.f32 %v1787_v55  ;;  %v1676_v22 = vsub.f32 %v2923_v19, %v3021_v50  ;;  %v1712_v38 = vsub.f32 %v2944_v21, %v3021_v50  ;;  %v1748_v3 = vsub.f32 %v2980_v34, %v3021_v50 }
 0x13e   : > { %2210 = vpow2.f32 %v1681_v16  ;;  %v1784_v37 = vsub.f32 %v1660_v7, %v3021_v50 }
 0x13f   : > { %2212 = vpow2.f32 %v1717_v48  ;;  %v1683_v54 = vmul.f32 1.442695, %v1676_v22  ;;  %v1719_v23 = vmul.f32 1.442695, %v1712_v38  ;;  %v1755_v61 = vmul.f32 1.442695, %v1748_v3 }
 0x140   : > { %2214 = vpow2.f32 %v1753_v49  ;;  %v1791_v62 = vmul.f32 1.442695, %v1784_v37 }
 0x141   : > { %2216 = vpow2.f32 %v1789_v17 }
 0x142   : > { %2218 = vpow2.f32 %v1683_v54 }
 0x143   : > { %v2195_v63 = vpop.eup %2194  ;;  %2220 = vpow2.f32 %v1719_v23 }
 0x144   : > { %v2197_v39 = vpop.eup %2196  ;;  %2222 = vpow2.f32 %v1755_v61 }
 0x145   : > { %v2199_v19 = vpop.eup %2198  ;;  %v1721_v5 = vadd.f32 %v2197_v39, %v2195_v63  ;;  %2224 = vpow2.f32 %v1791_v62 }
 0x146   : > { %v2201_v21 = vpop.eup %2200 }
 0x147   : > { %v2203_v59 = vpop.eup %2202  ;;  %v1757_v4 = vadd.f32 %v2199_v19, %v1721_v5 }
 0x148   : > { %v2205_v40 = vpop.eup %2204 }
 0x149   : > { %v2207_v35 = vpop.eup %2206  ;;  %v1722_v12 = vadd.f32 %v2205_v40, %v2203_v59  ;;  %v1793_v34 = vadd.f32 %v2201_v21, %v1757_v4 }
 0x14a   : > { %v2209_v13 = vpop.eup %2208 }
 0x14b   : > { %v2211_v14 = vpop.eup %2210  ;;  %v1758_v53 = vadd.f32 %v2207_v35, %v1722_v12  ;;  %2226 = vlog2.f32 %v1793_v34 }
 0x14c   : > { %v2213_v47 = vpop.eup %2212 }
 0x14d   : > { %v2215_v57 = vpop.eup %2214  ;;  %v1723_v30 = vadd.f32 %v2213_v47, %v2211_v14  ;;  %v1794_v60 = vadd.f32 %v2209_v13, %v1758_v53 }
 0x14e   : > { %v2217_v29 = vpop.eup %2216 }
 0x14f   : > { %v2219_v26 = vpop.eup %2218  ;;  %v1759_v28 = vadd.f32 %v2215_v57, %v1723_v30  ;;  %2228 = vlog2.f32 %v1794_v60 }
 0x150   : > { %v2221_v56 = vpop.eup %2220 }
 0x151   : > { %v1724_v8 = vadd.f32 %v2221_v56, %v2219_v26  ;;  %v1795_v32 = vadd.f32 %v2217_v29, %v1759_v28  ;;  %v2223_v43 = vpop.eup %2222 }
 0x152   : > { %v2225_v36 = vpop.eup %2224 }
 0x153   : > { %v1760_v33 = vadd.f32 %v2223_v43, %v1724_v8  ;;  %2230 = vlog2.f32 %v1795_v32 }
 0x155   : > { %v1796_v0 = vadd.f32 %v2225_v36, %v1760_v33 }
 0x157   : > { %2232 = vlog2.f32 %v1796_v0 }
 0x158   : > { %v2227_v27 = vpop.eup %2226 }
 0x159   : > { %v1818_v41 = vmul.f32 0.6931472, %v2227_v27 }
 0x15b   : > { %v1825_v51 = vadd.f32 %v1818_v41, %v2975_v15 }
 0x15c   : > { %v2229_v44 = vpop.eup %2228 }
 0x15d   : > { %v1820_v55 = vmul.f32 0.6931472, %v2229_v44  ;;  %v1829_v18 = vsub.f32 %v1825_v51, %v3010_v58 }
 0x15f   : > { %v1826_v25 = vadd.f32 %v1820_v55, %v2982_v1 }
 0x160   : > { %v2231_v20 = vpop.eup %2230 }
 0x161   : > { %v1822_v45 = vmul.f32 0.6931472, %v2231_v20  ;;  %v1830_v11 = vsub.f32 %v1826_v25, %v3019_v42 }
 0x163   : > { %v1827_v10 = vadd.f32 %v1822_v45, %v3002_v9  ;;  %v1833_v46 = vadd.f32 %v1830_v11, %v1829_v18 }
 0x164   : > { %v2233_v6 = vpop.eup %2232 }
 0x165   : > { %v1824_v24 = vmul.f32 0.6931472, %v2233_v6  ;;  %v1831_v7 = vsub.f32 %v1827_v10, %v3025_v31 }
 0x167   : > { %v1828_v15 = vadd.f32 %v1824_v24, %v3021_v50  ;;  %v1835_v16 = vsel %vm1834_vm0, %v1831_v7, 0.0 }
 0x168   : > { %v1836_v58 = vadd.f32 %v1835_v16, %v1833_v46 }
 0x169   : > { %v1832_v1 = vsub.f32 %v1828_v15, %v3027_v52 }
 0x16b   : > { %v1837_v48 = vsel %vm1834_vm0, %v1832_v1, 0.0 }
 0x16c   : > { %v1838_v49 = vadd.f32 %v1837_v48, %v1836_v58 }
 0x16e   : > { %1839 = vadd.xlane.f32.xlu0 %v1838_v49 }
 0x1f7   : > { %v1840_v42 = vpop.xlane.xlu0 %1839 }
 0x1f8   : > { %v1841_v2 = vrot.slane %v1840_v42, 4 }
 0x1fa   : > { %v1842_v9 = vadd.f32 %v1841_v2, %v1840_v42 }
 0x1fc   : > { %v1843_v17 = vrot.slane %v1842_v9, 2 }
 0x1fe   : > { %v1844_v22 = vadd.f32 %v1843_v17, %v1842_v9 }
 0x200   : > { %v1845_v38 = vrot.slane %v1844_v22, 1 }
 0x202   : > { %v1846_v3 = vadd.f32 %v1845_v38, %v1844_v22 }
 0x204   : > { %2112 = vpush %v1846_v3 }
 0x235   : > { %s2113_s28 = spop %2112 }
 0x236   : > { %1856 = sst [smem:[%s1855_s7]] %s2113_s28 }
 0x237   : > { %2331 = shalt.err (!%p2328_p4)
}
 0x238   : > { %s2401_s24 = smov [#allocation8]  }
 0x239   : > { %2121 = dma.smem_to_vmem (%p2135_p7), %s2401_s24, 32, %s1865_s14, [#allocation4]  }
 0x23a   : > { %2365 = dma.done.wait (%p2135_p7), [#allocation4], 32  }
 0x23b   : > { %2367 = vsyncadd (%p2135_p7), [#allocation4], 4294967264 }
 0x23c   : > { %1872 = sfence }
 0x23d PF: > { %s23_s26 = sadd.s32 1, %s2390_s26   ;;  %s3107_s19 = sld [smem:[#allocation12_spill]] }
 0x23e   : > { %p20_p5 = scmp.ge.s32.totalorder %s23_s26, 4   ;;  %s3108_s21 = smov %s2374_s22 }
 0x23f   : > { %s3109_s22 = smov %s2378_s23  ;;  %s3110_s23 = smov %s2485_s8 }
 0x240   : > { %s3111_s24 = smov %s2386_s25  ;;  %22 = sbr.rel (!%p20_p5) target bundleno = 10 (0xa), region = 165 }
 0x243   : > { %s3112_s25 = smov %s3107_s19 }
 0x245   :  { %1878 = vsyncpa [#allocation3], 1 }
 0x246   :  { %1880 = vsyncpa [#allocation3 + $0x1], 1 }
 0x247   :  { %1881 = vsyncpa [#allocation6], 1 }
 0x248   :  { %1883 = vsyncpa [#allocation6 + $0x1], 1 }
 0x249   :  { %1884 = vsyncpa [#allocation4], 1 }
 0x24a   :  { %1886 = vsyncpa [#allocation4 + $0x1], 1 }

</bundles_post_ra>
